<compile_context>
chip_gen: v7x
topology: tpu7x:2x2x1
jax: 0.10.0
libtpu: 0.0.40
codegen_flags: <defaults>
</compile_context>

<pallas_src>
import jax
import jax.numpy as jnp
from jax.experimental import pallas as pl
from jax.experimental.pallas import tpu as pltpu


# --------------------------------------------------------------------------
# Pallas kernel: fused (style-modulated weight) @ activation tile
# --------------------------------------------------------------------------
def _rgb_modconv_kernel(wmod_ref, x_ref, o_ref):
    # wmod_ref: (Bt, Cout, Cin)  style-modulated 1x1 conv weight (tiny)
    # x_ref:    (Bt, Cin, T)     activation tile, T lane-dense (multiple of 128)
    # o_ref:    (Bt, Cout, T)
    acc = jnp.einsum("boc,bct->bot", wmod_ref[...], x_ref[...],
                     preferred_element_type=jnp.float32)
    o_ref[...] = acc.astype(o_ref.dtype)


# --------------------------------------------------------------------------
# Generation-aware VMEM budget + tile selection
# --------------------------------------------------------------------------
def _vmem_limit_bytes():
    cap = 128 * 1024 * 1024
    try:
        info = pltpu.get_tpu_info()
        for attr in ("vmem_capacity_bytes", "vmem_bytes"):
            v = getattr(info, attr, None)
            if v is not None:
                cap = int(v)
                break
    except Exception:
        pass
    if cap <= 64 * 1024 * 1024:        # v7x-class: 64 MiB physical VMEM
        return 48 * 1024 * 1024
    return 96 * 1024 * 1024            # v5e / v6e: 128 MiB physical VMEM


def _choose_tiling(B, Cin, Cout, HW_pad, itemsize, vmem_limit):
    """Pick (hw_tile, batch_block) so the double-buffered footprint fits VMEM."""
    footprint_budget = min(vmem_limit - (8 << 20), vmem_limit * 3 // 4)
    max_x_tile_bytes = 8 << 20   # per-step activation DMA cap (roofline plateau)

    def footprint(bt, t):
        x_buf = bt * Cin * t * itemsize
        o_buf = bt * Cout * t * itemsize
        w_buf = bt * Cout * Cin * 4
        return 2 * (x_buf + o_buf + w_buf)    # pipeline double-buffers each operand

    # Candidate lane-aligned tiles that divide the (128-padded) HW extent.
    cands = [t for t in range(128, HW_pad + 1, 128) if HW_pad % t == 0]
    # v7x has 2 TensorCores: with B == 1 never collapse to a single grid point.
    if B == 1 and HW_pad >= 256:
        cands = [t for t in cands if t <= HW_pad // 2] or [128]

    tile = 128
    for t in cands:
        if (footprint(1, t) <= footprint_budget
                and Cin * t * itemsize <= max_x_tile_bytes):
            tile = max(tile, t)

    # Small-HW layers: block several batch elements per grid step to amortize the
    # per-step overhead, while keeping >= 2 grid points for megacore sharding.
    bt = 1
    if HW_pad // tile == 1 and B > 1 and Cin * tile * itemsize < (1 << 20):
        for cand in range(1, B + 1):
            if (B % cand == 0 and (B // cand) >= 2
                    and footprint(cand, tile) <= footprint_budget):
                bt = max(bt, cand)
    return tile, bt


# --------------------------------------------------------------------------
# Forward wrapper
# --------------------------------------------------------------------------
def rgb_block_forward(params, x, w):
    """RGBBlock forward.  x: (B, Cin, H, W) NCHW, w: (B, latent_dim) -> (B, 3, H, W)."""
    B, Cin, H, W = x.shape
    Cout = params["weight"].shape[0]
    HW = H * W

    # Style Linear + weight modulation hoisted out of the per-tile body
    # (tiny, off the memory critical path; shrinks the per-step prologue).
    style = w.astype(jnp.float32) @ params["wsc"] + params["bsc"]        # (B, Cin)
    w_mod = style[:, None, :] * params["weight"][None]                   # (B, Cout, Cin)

    # NCHW already puts spatial last -> HW on the lane axis.  Pad HW to a multiple
    # of 128 so every tile is lane-aligned (zero columns are trimmed afterwards).
    x2 = x.reshape(B, Cin, HW)
    HW_pad = ((HW + 127) // 128) * 128
    if HW_pad != HW:
        x2 = jnp.pad(x2, ((0, 0), (0, 0), (0, HW_pad - HW)))

    # Kernel consumes x in its HBM dtype (bf16 upstream -> halves dominant traffic);
    # the matmul accumulates in f32 regardless.
    w_mod = w_mod.astype(x2.dtype)
    itemsize = jnp.dtype(x2.dtype).itemsize

    vmem_limit = _vmem_limit_bytes()
    tile, bt = _choose_tiling(B, Cin, Cout, HW_pad, itemsize, vmem_limit)
    n_tiles = HW_pad // tile
    nb = B // bt

    # Note: w_mod is only (Bt, Cout, Cin) per step (a few KiB) so default
    # double-buffering of it costs nothing; no Buffered(1) override needed.
    out = pl.pallas_call(
        _rgb_modconv_kernel,
        out_shape=jax.ShapeDtypeStruct((B, Cout, HW_pad), x2.dtype),
        grid=(nb, n_tiles),
        in_specs=[
            pl.BlockSpec((bt, Cout, Cin), lambda b, t: (b, 0, 0)),   # modulated weight
            pl.BlockSpec((bt, Cin, tile), lambda b, t: (b, 0, t)),   # activation tile
        ],
        out_specs=pl.BlockSpec((bt, Cout, tile), lambda b, t: (b, 0, t)),
        compiler_params=pltpu.CompilerParams(
            dimension_semantics=("parallel", "parallel"),
            vmem_limit_bytes=vmem_limit),
        cost_estimate=pl.CostEstimate(
            flops=2 * B * Cout * Cin * HW_pad,
            transcendentals=0,
            bytes_accessed=int(B * Cin * HW_pad * itemsize
                               + B * Cout * HW_pad * itemsize
                               + B * Cout * Cin * 4)),
    )(w_mod, x2)

    return out[:, :, :HW].reshape(B, Cout, H, W)


# --------------------------------------------------------------------------
# Parameter init (mirrors the PyTorch module: kaiming_normal_ fan_in weight,
# default Linear weight, bias overwritten with ones)
# --------------------------------------------------------------------------
def init_rgb_block_params(key, latent_dim, in_chan, out_chan=3):
    k_w, k_sc = jax.random.split(key)
    fan_in = in_chan * 1 * 1  # kernel = 1
    weight = (jax.random.normal(k_w, (out_chan, in_chan))
              * jnp.sqrt(2.0 / fan_in)).astype(jnp.float32)
    wsc = (jax.random.normal(k_sc, (latent_dim, in_chan))
           / jnp.sqrt(latent_dim)).astype(jnp.float32)
    bsc = jnp.ones((1, in_chan), jnp.float32)  # style_converter bias = ones
    return {"weight": weight, "wsc": wsc, "bsc": bsc}


# --------------------------------------------------------------------------
# Pure-JAX reference (mirrors the PyTorch grouped-conv formulation)
# --------------------------------------------------------------------------
def rgb_block_reference(params, x, w):
    style = w @ params["wsc"] + params["bsc"]                 # (B, Cin)
    wm = style[:, None, :] * params["weight"][None]           # (B, Cout, Cin)
    return jnp.einsum("boc,bchw->bohw", wm, x)                # (B, Cout, H, W)


# --------------------------------------------------------------------------
if __name__ == "__main__":
    B, CIN, H, W, NZ = 2, 16, 16, 16, 32
    key = jax.random.PRNGKey(0)
    kp, kx, kw = jax.random.split(key, 3)

    params = init_rgb_block_params(kp, NZ, CIN)
    x = jax.random.normal(kx, (B, CIN, H, W), dtype=jnp.float32)
    w = jax.random.normal(kw, (B, NZ), dtype=jnp.float32)

    out = rgb_block_forward(params, x, w)          # f32 path (exact semantics)
    out = jax.block_until_ready(out)

    ref = rgb_block_reference(params, x, w)
    assert out.shape == (B, 3, H, W), out.shape
    assert bool(jnp.all(jnp.isfinite(out)))
    err = float(jnp.max(jnp.abs(out - ref)))
    assert bool(jnp.allclose(out, ref, rtol=1e-5, atol=1e-5)), err

    print("KERNEL_OK")
</pallas_src>

<mosaic_0001>
module attributes {stable_mosaic.version = 11 : i64} {
  func.func @_rgb_modconv_kernel(%arg0: i32, %arg1: i32, %arg2: memref<1x3x16xf32, #tpu.memory_space<vmem>>, %arg3: memref<1x16x256xf32, #tpu.memory_space<vmem>>, %arg4: memref<1x3x256xf32, #tpu.memory_space<vmem>>) attributes {dimension_semantics = [#tpu.dimension_semantics<parallel>, #tpu.dimension_semantics<parallel>], iteration_bounds = array<i64: 2, 1>, scalar_prefetch = 0 : i64, scratch_operands = 0 : i64, tpu.core_type = #tpu.core_type<tc>, window_params = [{transform_indices = @transform_0, window_bounds = array<i64: 1, 3, 16>}, {transform_indices = @transform_1, window_bounds = array<i64: 1, 16, 256>}, {transform_indices = @transform_2, window_bounds = array<i64: 1, 3, 256>}]} {
    %c0 = arith.constant 0 : index
    %c0_0 = arith.constant 0 : index
    %c0_1 = arith.constant 0 : index
    %0 = vector.load %arg2[%c0, %c0_0, %c0_1] : memref<1x3x16xf32, #tpu.memory_space<vmem>>, vector<1x3x16xf32>
    %c0_2 = arith.constant 0 : index
    %c0_3 = arith.constant 0 : index
    %c0_4 = arith.constant 0 : index
    %1 = vector.load %arg3[%c0_2, %c0_3, %c0_4] : memref<1x16x256xf32, #tpu.memory_space<vmem>>, vector<1x16x256xf32>
    "tpu.trace_start"() <{level = 10 : i32, message = "boc,bct->bot"}> : () -> ()
    %cst = arith.constant dense<0.000000e+00> : vector<1x3x256xf32>
    %2 = tpu.matmul %0, %1, %cst {dimension_numbers = #tpu.dot_dimension_numbers<[2], [1], [1], [2], [0, 0, 0, 1, 1, 2], [0], [0]>} : vector<1x3x16xf32>, vector<1x16x256xf32>, vector<1x3x256xf32> -> vector<1x3x256xf32>
    "tpu.trace_stop"() : () -> ()
    %c0_5 = arith.constant 0 : index
    %c0_6 = arith.constant 0 : index
    %c0_7 = arith.constant 0 : index
    %3 = vector.load %arg4[%c0_5, %c0_6, %c0_7] : memref<1x3x256xf32, #tpu.memory_space<vmem>>, vector<1x3x256xf32>
    tpu.vector_store %arg4[%c0_5, %c0_6, %c0_7], %2 {strides = array<i32>} : memref<1x3x256xf32, #tpu.memory_space<vmem>>, vector<1x3x256xf32>,
    return
  }
  func.func @transform_0(%arg0: i32, %arg1: i32) -> (i32, i32, i32) {
    %c0_i32 = arith.constant 0 : i32
    %c0_i32_0 = arith.constant 0 : i32
    %c0_i32_1 = arith.constant 0 : i32
    return %arg0, %c0_i32, %c0_i32_0 : i32, i32, i32
  }
  func.func @transform_1(%arg0: i32, %arg1: i32) -> (i32, i32, i32) {
    %c0_i32 = arith.constant 0 : i32
    %c0_i32_0 = arith.constant 0 : i32
    return %arg0, %c0_i32, %arg1 : i32, i32, i32
  }
  func.func @transform_2(%arg0: i32, %arg1: i32) -> (i32, i32, i32) {
    %c0_i32 = arith.constant 0 : i32
    %c0_i32_0 = arith.constant 0 : i32
    return %arg0, %c0_i32, %arg1 : i32, i32, i32
  }
}

</mosaic_0001>

<bundles_post_ra>
// kernel: tpu_custom_call.1
= control target key start
LH: loop header
LB: loop body
LE: loop exit
PB: predicated region body
PF: predicated region fallthrough
CT: control target
= control target key end

     0   :  { %7 = vsyncpa [#allocation3], 0  ;;  %s916_s0 = inlined_call_operand.hbm [shape: f32[2,3,16], index: 0, kind: input, shape index: {}]   ;;  %s917_s1 = inlined_call_operand.hbm [shape: f32[2,16,256], index: 1, kind: input, shape index: {}]   ;;  %s918_s2 = inlined_call_operand.hbm [shape: f32[2,3,256], index: 2, kind: output, shape index: {}]  }
   0x1   :  { %9 = vsyncpa [#allocation3 + $0x1], 0 }
   0x2   :  { %10 = vsyncpa [#allocation6], 0 }
   0x3   :  { %12 = vsyncpa [#allocation6 + $0x1], 0 }
   0x4   :  { %13 = vsyncpa [#allocation4], 0 }
   0x5   :  { %15 = vsyncpa [#allocation4 + $0x1], 0  ;;  %s692_s9 = smov 0   ;;  %s694_s10 = smov 0  }
   0x6   :  { %s696_s11 = smov 0   ;;  %s698_s12 = smov 0  }
   0x7   :  { %s700_s13 = smov 0   ;;  %s702_s14 = smov 0  }
   0x8 LB: > { %s428_s15 = sadd.s32 4294967295, %s669_s14   ;;  %s429_s16 = sadd.s32 4294967294, %s669_s14   ;;  %s669_s14 = sphi %s702_s14, %s21_s14   ;;  %s665_s13 = sphi %s700_s13, %s937_s13   ;;  %s661_s12 = sphi %s698_s12, %s936_s12   ;;  %s657_s11 = sphi %s696_s11, %s935_s11   ;;  %s653_s10 = sphi %s694_s10, %s934_s10   ;;  %s649_s9 = sphi %s692_s9, %s933_s9  }
   0x9   : > { %s33_s17 = sadd.s32 1, %s665_s13  ;;  %s40_s18 = sadd.s32 1, %s657_s11 }
   0xa   : > { %p35_p0 = scmp.ge.s32.totalorder %s33_s17, 2  ;;  %p47_p1 = scmp.ne.s32.totalorder %s657_s11, %s653_s10 }
   0xb   : > { %p48_p2 = scmp.eq.s32.totalorder %s669_s14, 0  ;;  %p53_p3 = scmp.ne.s32.totalorder %s653_s10, %s649_s9 }
   0xc   : > { %s939_s17 = smov (%p35_p0, %s33_s17), 0  ;;  %p54_p5 = scmp.eq.s32.totalorder %s428_s15, 0 }
   0xd   : > { %p733_p4 = por %p48_p2, %p47_p1  ;;  %s37_s20 = ssub.s32 %s665_s13, %s939_s17 }
   0xe   : > { %p107_p6 = scmp.eq.s32.totalorder %s428_s15, 1  ;;  %p38_p7 = scmp.eq.s32.totalorder %s37_s20, 0 }
   0xf   : > { %p739_p8 = por %p54_p5, %p53_p3  ;;  %p113_p10 = scmp.eq.s32.totalorder %s429_s16, 1 }
  0x10   : > { %p743_p9 = por %p107_p6, %p47_p1  ;;  %p470_p13 = scmp.lt.s32.totalorder %s669_s14, 2 }
  0x11   : > { %s922_s21 = scalar_select %p739_p8, 1, 0 }
  0x12   : > { %s923_s22 = scalar_select %p743_p9, 1, 0 }
  0x13   : > { %s748_s23 = scalar_select %p38_p7, %s657_s11, %s40_s18  }
  0x14   : > { %p750_p11 = por %p113_p10, %p53_p3  ;;  %s757_s25 = sand.u32 1, %s657_s11  }
  0x15   : > { %s432_s26 = sshll.u32 %s757_s25, 2  ;;  %s433_s27 = sshll.u32 %s665_s13, 6 }
  0x16   : > { %s924_s24 = scalar_select %p750_p11, 1, 0 }
  0x17   : > { %s764_s30 = scalar_lea.hbm %s916_s0, %s433_s27  ;;  %s137_s3 = scalar_lea.vmem [#allocation2], %s432_s26 }
  0x18   : > { %s144_s4 = sshll.u32 %s137_s3, 4  ;;  %p770_p0 = pnand %p470_p13, %p733_p4  ;;  %s766_s4 = int_to_ptr.vmem [resolvable:$true] %s144_s4 }
  0x19   : > { %s134_s6 = scalar_lea.sflag [#allocation3], %s757_s25  ;;  %s523_s7 = scalar_lea.hbm %s764_s30, 64 }
  0x1a   : > { %p524_p3 = scmp.ne.s32.totalorder %s764_s30, %s523_s7  ;;  %p525_p5 = pneg %p770_p0 }
  0x1b   : > { %s528_s16 = scalar_lea.hbm %s916_s0, 128  ;;  %p529_p4 = scmp.lt.u32.totalorder %s764_s30, %s916_s0 }
  0x1c   : > { %p526_p6 = pnand %p525_p5, %p524_p3  ;;  %p530_p10 = scmp.lt.u32.totalorder %s528_s16, %s523_s7 }
  0x1d   : > { %p532_p12 = scmp.lt.u32.totalorder %s523_s7, %s764_s30 }
  0x1e   : > { %p527_p7 = pneg %p526_p6  ;;  %p531_p13 = por %p530_p10, %p529_p4 }
  0x20   : > { %p533_p1 = por %p532_p12, %p531_p13 }
  0x22   : > { %p534_p2 = pnand %p533_p1, %p527_p7 }
  0x24   : > { %537 = shalt.err (!%p534_p2)
}
  0x25   : > { %s538_s20 = scalar_lea.vmem %s766_s4, 64  ;;  %s671_s26 = smov [#allocation2]  }
  0x26   : > { %p539_p3 = scmp.ne.s32.totalorder %s766_s4, %s538_s20  ;;  %s543_s27 = sshll.u32 %s671_s26, 4  ;;  %s544_s27 = int_to_ptr.vmem [resolvable:$false] %s543_s27 }
  0x27   : > { %s545_s28 = scalar_lea.vmem %s544_s27, 128  ;;  %p546_p9 = scmp.lt.s32.totalorder %s766_s4, %s544_s27 }
  0x28   : > { %p541_p6 = pnand %p539_p3, %p525_p5  ;;  %p547_p4 = scmp.lt.s32.totalorder %s545_s28, %s538_s20 }
  0x2a   : > { %p542_p11 = pneg %p541_p6  ;;  %p548_p10 = por %p547_p4, %p546_p9 }
  0x2c   : > { %p549_p12 = pnand %p548_p10, %p542_p11 }
  0x2e   : > { %552 = shalt.err (!%p549_p12)
}
  0x2f   : > { %462 = dma.hbm_to_vmem [thread:$0]  (!%p770_p0), %s764_s30, 64, %s766_s4, %s134_s6  }
  0x30   : > { %p926_p1 = scmp.lt.s32.totalorder %s669_s14, 3  ;;  %p927_p2 = scmp.ge.s32.totalorder %s669_s14, 1 }
  0x31   : > { %s434_s3 = sshll.u32 %s757_s25, 5  ;;  %s447_s7 = sshll.u32 %s665_s13, 9 }
  0x32   : > { %p806_p7 = pnand %p927_p2, %p926_p1  ;;  %s815_s16 = scalar_lea.hbm %s917_s1, %s447_s7 }
  0x33   : > { %s155_s18 = scalar_lea.vmem [#allocation5], %s434_s3  ;;  %s152_s30 = scalar_lea.sflag [#allocation6], %s757_s25 }
  0x34   : > { %s164_s19 = sshll.u32 %s155_s18, 4  ;;  %s553_s4 = scalar_lea.hbm %s815_s16, 512  ;;  %s817_s19 = int_to_ptr.vmem [resolvable:$true] %s164_s19 }
  0x35   : > { %p554_p9 = scmp.ne.s32.totalorder %s815_s16, %s553_s4  ;;  %s558_s26 = scalar_lea.hbm %s917_s1, 1024 }
  0x36   : > { %p559_p3 = scmp.lt.u32.totalorder %s815_s16, %s917_s1  ;;  %p560_p6 = scmp.lt.u32.totalorder %s558_s26, %s553_s4 }
  0x37   : > { %p556_p11 = pnand %p554_p9, %p525_p5  ;;  %p562_p10 = scmp.lt.u32.totalorder %s553_s4, %s815_s16 }
  0x38   : > { %p561_p4 = por %p560_p6, %p559_p3 }
  0x39   : > { %p557_p13 = pneg %p556_p11 }
  0x3a   : > { %p563_p12 = por %p562_p10, %p561_p4 }
  0x3c   : > { %p564_p1 = pnand %p563_p12, %p557_p13 }
  0x3e   : > { %567 = shalt.err (!%p564_p1)
}
  0x3f   : > { %s568_s3 = scalar_lea.vmem %s817_s19, 512  ;;  %s672_s7 = smov [#allocation5]  }
  0x40   : > { %p569_p2 = scmp.ne.s32.totalorder %s817_s19, %s568_s3  ;;  %s573_s8 = sshll.u32 %s672_s7, 4  ;;  %s574_s8 = int_to_ptr.vmem [resolvable:$false] %s573_s8 }
  0x41   : > { %s575_s15 = scalar_lea.vmem %s574_s8, 1024  ;;  %p576_p8 = scmp.lt.s32.totalorder %s817_s19, %s574_s8 }
  0x42   : > { %p571_p9 = pnand %p569_p2, %p525_p5  ;;  %p577_p3 = scmp.lt.s32.totalorder %s575_s15, %s568_s3 }
  0x44   : > { %p572_p11 = pneg %p571_p9  ;;  %p578_p6 = por %p577_p3, %p576_p8 }
  0x46   : > { %p579_p4 = pnand %p578_p6, %p572_p11 }
  0x48   : > { %582 = shalt.err (!%p579_p4)
}
  0x49   : > { %s673_s18 = smov 256   ;;  %s674_s4 = smov 16  }
  0x4a   : > { %465 = dma.hbm_to_vmem [thread:$0]  (!%p770_p0), %s815_s16, 512, %s817_s19, %s152_s30, %s673_s18, %s673_s18, %s674_s4  }
  0x4b   : > { %176 = sbr.rel (%p806_p7) target bundleno = 322 (0x142), region = 28  ;;  %s848_s6 = sand.u32 (!%p806_p7), 1, %s653_s10  }
  0x4c   : > { %s438_s20 = sshll.u32 (!%p806_p7), %s848_s6, 2  ;;  %s179_s26 = scalar_lea.sflag (!%p806_p7), [#allocation3], %s848_s6 }
  0x4d   : > { %s182_s27 = scalar_lea.vmem (!%p806_p7), [#allocation2], %s438_s20  ;;  %p929_p8 = scmp.ne.s32.totalorder (!%p806_p7), %s922_s21, 0 }
  0x52   : > { %636 = dma.done.wait (%p929_p8), %s179_s26, 64  }
  0x53   : > { %638 = vsyncadd (%p929_p8), %s179_s26, 4294967232  ;;  %s439_s25 = sshll.u32 %s848_s6, 5  ;;  %s188_s5 = scalar_lea.sflag [#allocation6], %s848_s6 }
  0x54   : > { %s191_s29 = scalar_lea.vmem [#allocation5], %s439_s25 }
  0x55   : > { %640 = dma.done.wait (%p929_p8), %s188_s5, 512  }
  0x56   : > { %642 = vsyncadd (%p929_p8), %s188_s5, 4294966784  ;;  %v675_v0 = vmov 0.0   ;;  %v221_v1 = vld [vmem:[%s191_s29 + $0x8] sm:$0xff]  ;;  %v223_v2 = vld [vmem:[%s191_s29 + $0x18] sm:$0xff]  ;;  %vm224_vm0 = vcmask 130048   ;;  %s440_s16 = sshll.u32 %s848_s6, 3 }
  0x57   : > { %292 = vmatprep.mubr.f32.mxu0 %v675_v0  ;;  %v220_v3 = vld [vmem:[%s191_s29] sm:$0xff]  ;;  %v449_v4 = vpack.c.bf16 %v223_v2, %v221_v1  ;;  %v222_v5 = vld [vmem:[%s191_s29 + $0x10] sm:$0xff]  ;;  %v219_v7 = vld [vmem:[%s182_s27] sm:$0x7]  ;;  %s448_s21 = sshll.u32 %s661_s12, 7  ;;  %s216_s19 = scalar_lea.vmem [#allocation7], %s440_s16 }
  0x58   : > { %v451_v6 = vpack.c.bf16 %v222_v5, %v220_v3  ;;  %s321_s30 = sshll.u32 %s216_s19, 4  ;;  %s867_s7 = scalar_lea.hbm %s918_s2, %s448_s21  ;;  %s869_s30 = int_to_ptr.vmem [resolvable:$true] %s321_s30 }
  0x59   : > { %450 = vmatprep.subr.bf16.mxu0 %v449_v4  ;;  %s305_s8 = scalar_lea.sflag [#allocation4], %s848_s6  ;;  %s583_s15 = scalar_lea.vmem %s869_s30, 128 }
  0x5a   : > { %452 = vmatpush1.bf16.msra.mxu0 %v451_v6  ;;  %p584_p0 = scmp.ne.s32.totalorder %s869_s30, %s583_s15  ;;  %p930_p5 = scmp.ne.s32.totalorder %s923_s22, 0 }
  0x5b   : > { %s676_s12 = smov [#allocation7]  }
  0x5c   : > { %p585_p7 = pnand %p584_p0, %p930_p5  ;;  %s587_s18 = sshll.u32 %s676_s12, 4  ;;  %s588_s18 = int_to_ptr.vmem [resolvable:$false] %s587_s18 }
  0x5d   : > { %441 = vmatmul.mubr.msk.f32.vlgmr.msra.gmra.mrb[0].mxu0 %vm224_vm0, %v219_v7  ;;  %s589_s4 = scalar_lea.vmem %s588_s18, 256  ;;  %p590_p10 = scmp.lt.s32.totalorder %s869_s30, %s588_s18 }
  0x5e   : > { %p586_p13 = pneg %p585_p7  ;;  %p591_p12 = scmp.lt.s32.totalorder %s589_s4, %s583_s15 }
  0x60   : > { %p592_p1 = por %p591_p12, %p590_p10 }
  0x62   : > { %p593_p2 = pnand %p592_p1, %p586_p13 }
 0x130   : > { %v294_v8 = vpop.f32.mrb[0].mxu0 }
 0x131   : > { %v296_v9 = vpop.f32.mrb[1].mxu0 }
 0x132   : > { %v301_v10 = vcombine.low %v294_v8, %v296_v9 }
 0x134   : > { %303 = vst [vmem:[%s216_s19] sm:$0x77] %v301_v10 }
 0x135   : > { %596 = shalt.err (!%p593_p2)
}
 0x136   : > { %s597_s6 = scalar_lea.hbm %s867_s7, 128  ;;  %s601_s27 = scalar_lea.hbm %s918_s2, 256 }
 0x137   : > { %p598_p9 = scmp.ne.s32.totalorder %s867_s7, %s597_s6  ;;  %p602_p6 = scmp.lt.u32.totalorder %s867_s7, %s918_s2 }
 0x138   : > { %p603_p4 = scmp.lt.u32.totalorder %s601_s27, %s597_s6  ;;  %p605_p0 = scmp.lt.u32.totalorder %s597_s6, %s867_s7 }
 0x139   : > { %p599_p11 = pnand %p598_p9, %p930_p5 }
 0x13a   : > { %p604_p8 = por %p603_p4, %p602_p6 }
 0x13b   : > { %p600_p3 = pneg %p599_p11 }
 0x13c   : > { %p606_p7 = por %p605_p0, %p604_p8 }
 0x13e   : > { %p607_p13 = pnand %p606_p7, %p600_p3 }
 0x140   : > { %610 = shalt.err (!%p607_p13)
}
 0x141   : > { %457 = dma.vmem_to_hbm [thread:$0]  (%p930_p5), %s869_s30, 128, %s867_s7, %s305_s8  }
 0x142 PF: > { %s333_s29 = sand.u32 1, %s649_s9   ;;  %p931_p10 = scmp.ne.s32.totalorder %s924_s24, 0 }
 0x143   : > { %p932_p12 = scmp.ge.s32.totalorder %s669_s14, 2  ;;  %s334_s16 = scalar_lea.sflag [#allocation4], %s333_s29 }
 0x145   : > { %p467_p1 = pnand %p932_p12, %p931_p10 }
 0x147   : > { %644 = dma.done.wait (!%p467_p1), %s334_s16, 128  }
 0x148   : > { %646 = vsyncadd (!%p467_p1), %s334_s16, 4294967168  ;;  %s21_s14 = sadd.s32 1, %s669_s14   ;;  %s933_s9 = smov %s653_s10 }
 0x149   : > { %p18_p2 = scmp.ge.s32.totalorder %s21_s14, 4   ;;  %s934_s10 = smov %s657_s11 }
 0x14a   : > { %s935_s11 = smov %s748_s23  ;;  %s936_s12 = smov %s665_s13 }
 0x14b   : > { %s937_s13 = smov %s939_s17  ;;  %20 = sbr.rel (!%p18_p2) target bundleno = 8 (0x8), region = 86 }
 0x152   :  { %339 = vsyncpa [#allocation3], 1 }
 0x153   :  { %341 = vsyncpa [#allocation3 + $0x1], 1 }
 0x154   :  { %342 = vsyncpa [#allocation6], 1 }
 0x155   :  { %344 = vsyncpa [#allocation6 + $0x1], 1 }
 0x156   :  { %345 = vsyncpa [#allocation4], 1 }
 0x157   :  { %347 = vsyncpa [#allocation4 + $0x1], 1 }

</bundles_post_ra>
